<compile_context>
chip_gen: v7x
topology: tpu7x:2x2x1
jax: 0.10.0
libtpu: 0.0.40
codegen_flags: <defaults>
</compile_context>

<pallas_src>
import functools
import math

import jax
import jax.numpy as jnp
from jax.experimental import pallas as pl
from jax.experimental.pallas import tpu as pltpu


# ------------------------- fused encoder kernel -------------------------
def _encoder_kernel(a_ref, x_ref, w_ref, b_ref, p_ref, wg_ref, bg_ref, o_ref, *, k):
    n = a_ref.shape[0]

    # ---- GCNConv + ReLU.  Contract through the narrower feature width first:
    # (A @ X) @ W costs N^2*F + N*F*D  <  N*F*D + N^2*D  when F < D.
    # TODO(synk): cast MXU inputs to bf16 (keep preferred_element_type=f32) if N/F/D scale up.
    ax = jnp.dot(a_ref[...], x_ref[...], preferred_element_type=jnp.float32)       # [N, F]
    h = jnp.dot(ax, w_ref[...], preferred_element_type=jnp.float32) + b_ref[...]   # [N, D]
    h = jnp.maximum(h, 0.0)

    # ---- TopKPooling score: tanh((H @ p) / ||p||)   (projection on the MXU).
    p = p_ref[...]                                            # [D, 1]
    inv_norm = jax.lax.rsqrt(jnp.sum(p * p))
    u = jnp.dot(h, p, preferred_element_type=jnp.float32)     # [N, 1] raw projection
    score = jnp.tanh(u * inv_norm)                            # [N, 1]

    # ---- In-kernel top-k membership mask (tanh is monotonic -> rank on u).
    # Exact "row copy" of u via one tiny MXU matmul against diag(u) so the row- and
    # column-layout copies are bit-identical (deterministic tie-breaking, j < i wins,
    # matching torch.topk / jax.lax.top_k).
    row_i = jax.lax.broadcasted_iota(jnp.int32, (n, n), 0)    # i
    col_j = jax.lax.broadcasted_iota(jnp.int32, (n, n), 1)    # j
    u_i = jnp.broadcast_to(u, (n, n))                         # (i, j) -> u_i
    diag_u = jnp.where(row_i == col_j, u_i, 0.0)              # diag(u)
    u_row = jnp.dot(jnp.ones((1, n), jnp.float32), diag_u,
                    preferred_element_type=jnp.float32)       # [1, N]: u_row[0, j] = u_j
    beats = (u_row > u) | ((u_row == u) & (col_j < row_i))    # (i, j): node j beats node i
    rank = jnp.sum(jnp.where(beats, 1.0, 0.0), axis=-1, keepdims=True)   # [N, 1]
    mask = jnp.where(rank < float(k), 1.0, 0.0)               # [N, 1]: 1.0 on the top-k nodes

    # ---- GlobalAttention over the selected nodes (softmax of a linear gate).
    xp = h * score                                            # x[perm] * score[perm]
    gate = jnp.dot(xp, wg_ref[...],
                   preferred_element_type=jnp.float32) + bg_ref[0, 0]    # [N, 1]
    gate = jnp.where(mask > 0.0, gate, jnp.float32(-1e30))    # drop non-selected nodes
    gmax = jnp.max(gate, axis=0, keepdims=True)               # [1, 1]
    e = jnp.exp(gate - gmax) * mask                           # [N, 1]
    denom = jnp.sum(e, axis=0, keepdims=True)                 # [1, 1]
    alpha = e * pl.reciprocal(denom, approx=True)             # softmax weights
    # TODO(synk): for large N turn this sublane reduction into alpha^T @ xp on the MXU.
    o_ref[...] = jnp.sum(alpha * xp, axis=0, keepdims=True)   # [1, D] (lane-dense when D%128==0)


# --------------------------------- forward ---------------------------------
def graph_conv_encoder(x, edge_index, params, ratio=0.8):
    n = x.shape[0]
    d = params["w_gcn"].shape[1]

    # Glue (XLA): dense GCN-normalized adjacency D^-1/2 (A + I) D^-1/2 with self-loops.
    # Duplicate edges are summed (scatter-add), matching PyG's gcn_norm for multigraphs.
    # TODO(synk): for large graphs keep edge_index sparse (scalar-prefetch gather) instead
    # of the O(N^2) dense adjacency, and tile A with a (row, reduction) grid on v7x.
    a = jnp.zeros((n, n), jnp.float32)
    src, dst = edge_index[0], edge_index[1]
    a = a.at[dst, src].add(1.0)                        # message src -> dst
    a = a + jnp.eye(n, dtype=jnp.float32)              # add self loops
    deg = jnp.sum(a, axis=1)
    dinv = jax.lax.rsqrt(deg)
    a_norm = dinv[:, None] * a * dinv[None, :]

    k = int(math.ceil(ratio * n))                      # TopKPooling keeps ceil(ratio*N) nodes

    return pl.pallas_call(
        functools.partial(_encoder_kernel, k=k),
        out_shape=jax.ShapeDtypeStruct((1, d), jnp.float32),
        in_specs=[
            pl.BlockSpec(memory_space=pltpu.MemorySpace.VMEM),   # a_norm [N, N]
            pl.BlockSpec(memory_space=pltpu.MemorySpace.VMEM),   # x      [N, F]
            pl.BlockSpec(memory_space=pltpu.MemorySpace.VMEM),   # w_gcn  [F, D]
            pl.BlockSpec(memory_space=pltpu.MemorySpace.VMEM),   # b_gcn  [1, D]
            pl.BlockSpec(memory_space=pltpu.MemorySpace.VMEM),   # p_pool [D, 1]
            pl.BlockSpec(memory_space=pltpu.MemorySpace.VMEM),   # w_gate [D, 1]
            pl.BlockSpec(memory_space=pltpu.MemorySpace.SMEM),   # b_gate [1, 1] scalar
        ],
        out_specs=pl.BlockSpec(memory_space=pltpu.MemorySpace.VMEM),
    )(a_norm, x, params["w_gcn"], params["b_gcn"],
      params["p_pool"], params["w_gate"], params["b_gate"])


if __name__ == "__main__":
    N = 16            # number of nodes
    INPUT_DIM = 32    # small variant of input_dim=100
    OUTPUT_DIM = 128  # small variant of output_dim=200, kept lane-dense (multiple of 128)

    key = jax.random.PRNGKey(0)
    k_x, k_w, k_b, k_p, k_wg, k_bg = jax.random.split(key, 6)

    # Node features
    x = jax.random.normal(k_x, (N, INPUT_DIM), jnp.float32)

    # Symmetric ring graph edge_index [2, 2N]
    i = jnp.arange(N, dtype=jnp.int32)
    j = (i + 1) % N
    edge_index = jnp.stack(
        [jnp.concatenate([i, j]), jnp.concatenate([j, i])], axis=0
    )

    params = {
        "w_gcn": 0.1 * jax.random.normal(k_w, (INPUT_DIM, OUTPUT_DIM), jnp.float32),
        "b_gcn": 0.1 * jax.random.normal(k_b, (1, OUTPUT_DIM), jnp.float32),
        "p_pool": 0.1 * jax.random.normal(k_p, (OUTPUT_DIM, 1), jnp.float32),   # TopKPooling weight (column)
        "w_gate": 0.1 * jax.random.normal(k_wg, (OUTPUT_DIM, 1), jnp.float32),  # Linear(D,1).weight^T
        "b_gate": 0.1 * jax.random.normal(k_bg, (1, 1), jnp.float32),           # Linear(D,1).bias
    }

    out = jax.jit(graph_conv_encoder)(x, edge_index, params)
    out = jax.block_until_ready(out)
    assert out.shape == (1, OUTPUT_DIM)
    print("KERNEL_OK")
</pallas_src>

<mosaic_0001>
module attributes {stable_mosaic.version = 11 : i64} {
  func.func private @main(%arg0: i32) attributes {dimension_semantics = [#tpu.dimension_semantics<core_parallel>], iteration_bounds = array<i64: 2>, tpu.core_type = #tpu.core_type<sc_scalar_subcore>, window_params = []} {
    return
  }
}

module attributes {stable_mosaic.version = 11 : i64} {
  func.func private @main(%arg0: i32) attributes {dimension_semantics = [#tpu.dimension_semantics<core_parallel>], iteration_bounds = array<i64: 2>, tpu.core_type = #tpu.core_type<sc_scalar_subcore>, window_params = []} {
    return
  }
}

module attributes {stable_mosaic.version = 11 : i64} {
  func.func @_encoder_kernel(%arg0: memref<16x16xf32, #tpu.memory_space<vmem>>, %arg1: memref<16x32xf32, #tpu.memory_space<vmem>>, %arg2: memref<32x128xf32, #tpu.memory_space<vmem>>, %arg3: memref<1x128xf32, #tpu.memory_space<vmem>>, %arg4: memref<128x1xf32, #tpu.memory_space<vmem>>, %arg5: memref<128x1xf32, #tpu.memory_space<vmem>>, %arg6: memref<1x1xf32, #tpu.memory_space<smem>>, %arg7: memref<1x128xf32, #tpu.memory_space<vmem>>) attributes {dimension_semantics = [], scalar_prefetch = 0 : i64, scratch_operands = 0 : i64, tpu.core_type = #tpu.core_type<tc>} {
    %c0 = arith.constant 0 : index
    %c0_0 = arith.constant 0 : index
    %0 = vector.load %arg0[%c0, %c0_0] : memref<16x16xf32, #tpu.memory_space<vmem>>, vector<16x16xf32>
    %c0_1 = arith.constant 0 : index
    %c0_2 = arith.constant 0 : index
    %1 = vector.load %arg1[%c0_1, %c0_2] : memref<16x32xf32, #tpu.memory_space<vmem>>, vector<16x32xf32>
    %cst = arith.constant dense<0.000000e+00> : vector<16x32xf32>
    %2 = tpu.matmul %0, %1, %cst {dimension_numbers = #tpu.dot_dimension_numbers<[1], [0], [0], [1], [0, 0, 1, 1], [], []>} : vector<16x16xf32>, vector<16x32xf32>, vector<16x32xf32> -> vector<16x32xf32>
    %c0_3 = arith.constant 0 : index
    %c0_4 = arith.constant 0 : index
    %3 = vector.load %arg2[%c0_3, %c0_4] : memref<32x128xf32, #tpu.memory_space<vmem>>, vector<32x128xf32>
    %cst_5 = arith.constant dense<0.000000e+00> : vector<16x128xf32>
    %4 = tpu.matmul %2, %3, %cst_5 {dimension_numbers = #tpu.dot_dimension_numbers<[1], [0], [0], [1], [0, 0, 1, 1], [], []>} : vector<16x32xf32>, vector<32x128xf32>, vector<16x128xf32> -> vector<16x128xf32>
    %c0_6 = arith.constant 0 : index
    %c0_7 = arith.constant 0 : index
    %5 = vector.load %arg3[%c0_6, %c0_7] : memref<1x128xf32, #tpu.memory_space<vmem>>, vector<1x128xf32>
    %6 = vector.broadcast %5 : vector<1x128xf32> to vector<16x128xf32>
    %7 = arith.addf %4, %6 : vector<16x128xf32>
    %cst_8 = arith.constant 0.000000e+00 : f32
    %8 = vector.broadcast %cst_8 : f32 to vector<16x128xf32>
    %9 = arith.maximumf %7, %8 : vector<16x128xf32>
    %c0_9 = arith.constant 0 : index
    %c0_10 = arith.constant 0 : index
    %10 = vector.load %arg4[%c0_9, %c0_10] : memref<128x1xf32, #tpu.memory_space<vmem>>, vector<128x1xf32>
    %11 = arith.mulf %10, %10 : vector<128x1xf32>
    %12 = vector.shape_cast %11 : vector<128x1xf32> to vector<1x128x1xf32>
    %cst_11 = arith.constant dense<0.000000e+00> : vector<1xf32>
    %13 = vector.multi_reduction <add>, %12, %cst_11 [1, 2] : vector<1x128x1xf32> to vector<1xf32>
    %14 = vector.shape_cast %13 : vector<1xf32> to vector<1x1x1xf32>
    %15 = vector.extract %14[0, 0, 0] : f32 from vector<1x1x1xf32>
    %16 = math.rsqrt %15 : f32
    %cst_12 = arith.constant dense<0.000000e+00> : vector<16x1xf32>
    %17 = tpu.matmul %9, %10, %cst_12 {dimension_numbers = #tpu.dot_dimension_numbers<[1], [0], [0], [1], [0, 0, 1, 1], [], []>} : vector<16x128xf32>, vector<128x1xf32>, vector<16x1xf32> -> vector<16x1xf32>
    %18 = vector.broadcast %16 : f32 to vector<16x1xf32>
    %19 = arith.mulf %17, %18 : vector<16x1xf32>
    %20 = math.tanh %19 : vector<16x1xf32>
    %21 = tpu.iota {dimensions = array<i32: 0>} : vector<16x16xi32>
    %22 = tpu.iota {dimensions = array<i32: 1>} : vector<16x16xi32>
    %23 = vector.shape_cast %17 : vector<16x1xf32> to vector<16x1xf32>
    %24 = vector.broadcast %23 : vector<16x1xf32> to vector<16x16xf32>
    %25 = arith.cmpi eq, %21, %22 : vector<16x16xi32>
    %cst_13 = arith.constant 0.000000e+00 : f32
    %26 = vector.broadcast %cst_13 : f32 to vector<16x16xf32>
    %27 = arith.select %25, %24, %26 : vector<16x16xi1>, vector<16x16xf32>
    %cst_14 = arith.constant 1.000000e+00 : f32
    %28 = vector.broadcast %cst_14 : f32 to vector<1x16xf32>
    %cst_15 = arith.constant dense<0.000000e+00> : vector<1x16xf32>
    %29 = tpu.matmul %28, %27, %cst_15 {dimension_numbers = #tpu.dot_dimension_numbers<[1], [0], [0], [1], [0, 0, 1, 1], [], []>} : vector<1x16xf32>, vector<16x16xf32>, vector<1x16xf32> -> vector<1x16xf32>
    %30 = vector.broadcast %29 : vector<1x16xf32> to vector<16x16xf32>
    %31 = vector.broadcast %17 : vector<16x1xf32> to vector<16x16xf32>
    %32 = arith.cmpf ogt, %30, %31 : vector<16x16xf32>
    %33 = vector.broadcast %29 : vector<1x16xf32> to vector<16x16xf32>
    %34 = vector.broadcast %17 : vector<16x1xf32> to vector<16x16xf32>
    %35 = arith.cmpf oeq, %33, %34 : vector<16x16xf32>
    %36 = arith.cmpi slt, %22, %21 : vector<16x16xi32>
    %37 = arith.andi %35, %36 : vector<16x16xi1>
    %38 = arith.ori %32, %37 : vector<16x16xi1>
    %cst_16 = arith.constant 1.000000e+00 : f32
    %cst_17 = arith.constant 0.000000e+00 : f32
    %39 = vector.broadcast %cst_16 : f32 to vector<16x16xf32>
    %40 = vector.broadcast %cst_17 : f32 to vector<16x16xf32>
    %41 = arith.select %38, %39, %40 : vector<16x16xi1>, vector<16x16xf32>
    %cst_18 = arith.constant dense<0.000000e+00> : vector<16xf32>
    %42 = vector.multi_reduction <add>, %41, %cst_18 [1] : vector<16x16xf32> to vector<16xf32>
    %43 = vector.shape_cast %42 : vector<16xf32> to vector<16x1xf32>
    %cst_19 = arith.constant 1.300000e+01 : f32
    %44 = vector.broadcast %cst_19 : f32 to vector<16x1xf32>
    %45 = arith.cmpf olt, %43, %44 : vector<16x1xf32>
    %cst_20 = arith.constant 1.000000e+00 : f32
    %cst_21 = arith.constant 0.000000e+00 : f32
    %46 = vector.broadcast %cst_20 : f32 to vector<16x1xf32>
    %47 = vector.broadcast %cst_21 : f32 to vector<16x1xf32>
    %48 = arith.select %45, %46, %47 : vector<16x1xi1>, vector<16x1xf32>
    %49 = vector.broadcast %20 : vector<16x1xf32> to vector<16x128xf32>
    %50 = arith.mulf %9, %49 : vector<16x128xf32>
    %c0_22 = arith.constant 0 : index
    %c0_23 = arith.constant 0 : index
    %51 = vector.load %arg5[%c0_22, %c0_23] : memref<128x1xf32, #tpu.memory_space<vmem>>, vector<128x1xf32>
    %cst_24 = arith.constant dense<0.000000e+00> : vector<16x1xf32>
    %52 = tpu.matmul %50, %51, %cst_24 {dimension_numbers = #tpu.dot_dimension_numbers<[1], [0], [0], [1], [0, 0, 1, 1], [], []>} : vector<16x128xf32>, vector<128x1xf32>, vector<16x1xf32> -> vector<16x1xf32>
    %c0_25 = arith.constant 0 : index
    %c0_26 = arith.constant 0 : index
    %53 = memref.load %arg6[%c0_25, %c0_26] : memref<1x1xf32, #tpu.memory_space<smem>>
    %54 = vector.broadcast %53 : f32 to vector<16x1xf32>
    %55 = arith.addf %52, %54 : vector<16x1xf32>
    %cst_27 = arith.constant 0.000000e+00 : f32
    %56 = vector.broadcast %cst_27 : f32 to vector<16x1xf32>
    %57 = arith.cmpf ogt, %48, %56 : vector<16x1xf32>
    %cst_28 = arith.constant -1.000000e+30 : f32
    %58 = vector.broadcast %cst_28 : f32 to vector<16x1xf32>
    %59 = arith.select %57, %55, %58 : vector<16x1xi1>, vector<16x1xf32>
    %cst_29 = arith.constant dense<0xFF800000> : vector<1xf32>
    %60 = vector.multi_reduction <maximumf>, %59, %cst_29 [0] : vector<16x1xf32> to vector<1xf32>
    %61 = vector.shape_cast %60 : vector<1xf32> to vector<1x1xf32>
    %62 = vector.broadcast %61 : vector<1x1xf32> to vector<16x1xf32>
    %63 = arith.subf %59, %62 : vector<16x1xf32>
    %64 = math.exp %63 : vector<16x1xf32>
    %65 = arith.mulf %64, %48 : vector<16x1xf32>
    %cst_30 = arith.constant dense<0.000000e+00> : vector<1xf32>
    %66 = vector.multi_reduction <add>, %65, %cst_30 [0] : vector<16x1xf32> to vector<1xf32>
    %67 = vector.shape_cast %66 : vector<1xf32> to vector<1x1xf32>
    %68 = tpu.reciprocal %67 {approx = true} : vector<1x1xf32> -> vector<1x1xf32>
    %69 = vector.broadcast %68 : vector<1x1xf32> to vector<16x1xf32>
    %70 = arith.mulf %65, %69 : vector<16x1xf32>
    %71 = vector.broadcast %70 : vector<16x1xf32> to vector<16x128xf32>
    %72 = arith.mulf %71, %50 : vector<16x128xf32>
    %cst_31 = arith.constant dense<0.000000e+00> : vector<128xf32>
    %73 = vector.multi_reduction <add>, %72, %cst_31 [0] : vector<16x128xf32> to vector<128xf32>
    %74 = vector.shape_cast %73 : vector<128xf32> to vector<1x128xf32>
    %c0_32 = arith.constant 0 : index
    %c0_33 = arith.constant 0 : index
    %75 = vector.load %arg7[%c0_32, %c0_33] : memref<1x128xf32, #tpu.memory_space<vmem>>, vector<1x128xf32>
    tpu.vector_store %arg7[%c0_32, %c0_33], %74 {strides = array<i32>} : memref<1x128xf32, #tpu.memory_space<vmem>>, vector<1x128xf32>,
    return
  }
}

</mosaic_0001>

<bundles_post_ra>
// kernel: graph_conv_encoder.1
= control target key start
LH: loop header
LB: loop body
LE: loop exit
PB: predicated region body
PF: predicated region fallthrough
CT: control target
= control target key end

     0   :  { %vm32_vm0 = vcmask 130048   ;;  %s1171_s0 = inlined_call_operand.vmem [shape: f32[16,16], index: 0, kind: input, shape index: {}]   ;;  %s1172_s1 = inlined_call_operand.vmem [shape: f32[16,32], index: 1, kind: input, shape index: {}]   ;;  %s1173_s2 = inlined_call_operand.vmem [shape: f32[32,128], index: 2, kind: input, shape index: {}]   ;;  %s1174_s3 = inlined_call_operand.vmem [shape: f32[1,128], index: 3, kind: input, shape index: {}]   ;;  %s1175_s4 = inlined_call_operand.vmem [shape: f32[128,1], index: 4, kind: input, shape index: {}]   ;;  %s1176_s5 = inlined_call_operand.vmem [shape: f32[128,1], index: 5, kind: input, shape index: {}]   ;;  %s1177_s6 = inlined_call_operand.<no memory space> [shape: f32[1,1], index: 6, kind: input, shape index: {}]   ;;  %s1178_s7 = inlined_call_operand.hbm [shape: f32[1,128], index: 7, kind: output, shape index: {}]  }
   0x1   :  { %v30_v0 = vld [vmem:[%s1172_s1] sm:$0xff]  ;;  %v31_v1 = vld [vmem:[%s1172_s1 + $0x8] sm:$0xff]  ;;  %v116_v7 = vld [vmem:[%s1173_s2 + $0x10] sm:$0xff] }
   0x2   :  { %v28_v2 = vld [vmem:[%s1171_s0] sm:$0xff]  ;;  %v807_v3 = vpack.c.bf16 %v31_v1, %v30_v0  ;;  %v115_v5 = vld [vmem:[%s1173_s2 + $0x8] sm:$0xff]  ;;  %v117_v8 = vld [vmem:[%s1173_s2 + $0x18] sm:$0xff] }
   0x3   :  { %716 = vmatprep.mubr.msk.f32.mxu0 %vm32_vm0, %v28_v2  ;;  %v114_v4 = vld [vmem:[%s1173_s2] sm:$0xff] }
   0x4   :  { %v811_v6 = vpack.c.bf16 %v115_v5, %v114_v4 }
   0x5   :  { %13 = vsyncpa [#allocation4], 0  ;;  %808 = vmatprep.subr.bf16.mxu0 %v807_v3  ;;  %v815_v9 = vpack.c.bf16 %v117_v8, %v116_v7  ;;  %v29_v10 = vld [vmem:[%s1171_s0 + $0x8] sm:$0xff]  ;;  %v209_v11 = vld [vmem:[%s1175_s4] sm:$0xff]  ;;  %vm241_vm1 = vcmask 7168   ;;  %vm125_vm2 = vcmask 261120  }
   0x6   :  { %810 = vmatpush3.bf16.msra.mxu0 %v807_v3  ;;  %812 = vmatprep.subr.bf16.mxu1 %v811_v6  ;;  %v210_v12 = vld [vmem:[%s1175_s4 + $0x8] sm:$0xff]  ;;  %v211_v13 = vld [vmem:[%s1175_s4 + $0x10] sm:$0xff]  ;;  %v212_v14 = vld [vmem:[%s1175_s4 + $0x18] sm:$0xff]  ;;  %v225_v16 = vmul.f32 %v209_v11, %v209_v11  ;;  %vm937_vm3 = vmmov 0  }
   0x7   :  { %814 = vmatpush3.bf16.msra.mxu1 %v811_v6  ;;  %v213_v15 = vld [vmem:[%s1175_s4 + $0x20] sm:$0xff]  ;;  %v226_v17 = vmul.f32 %v210_v12, %v210_v12  ;;  %v819_v18 = vpack.c.bf16 %v210_v12, %v209_v11  ;;  %v227_v19 = vmul.f32 %v211_v13, %v211_v13  ;;  %v228_v20 = vmul.f32 %v212_v14, %v212_v14  ;;  %v214_v22 = vld [vmem:[%s1175_s4 + $0x28] sm:$0xff]  ;;  %v215_v26 = vld [vmem:[%s1175_s4 + $0x30] sm:$0xff] }
   0x8   :  { %816 = vmatprep.subr.bf16.mxu1 %v815_v9  ;;  %v823_v21 = vpack.c.bf16 %v212_v14, %v211_v13  ;;  %v242_v23 = vsel %vm241_vm1, %v225_v16, 0.0  ;;  %v229_v24 = vmul.f32 %v213_v15, %v213_v15  ;;  %v230_v28 = vmul.f32 %v214_v22, %v214_v22  ;;  %v216_v31 = vld [vmem:[%s1175_s4 + $0x38] sm:$0xff]  ;;  %v217_v35 = vld [vmem:[%s1175_s4 + $0x40] sm:$0xff]  ;;  %v218_v41 = vld [vmem:[%s1175_s4 + $0x48] sm:$0xff] }
   0x9   :  { %717 = vmatmul.mubr.msk.f32.vlgmr.msra.gmra.mrb[0].mxu0 %vm32_vm0, %v29_v10  ;;  %820 = vmatprep.subr.bf16.mxu0 %v819_v18  ;;  %v243_v25 = vsel %vm241_vm1, %v226_v17, 0.0  ;;  %v245_v29 = vsel %vm241_vm1, %v227_v19, 0.0  ;;  %v247_v30 = vsel %vm241_vm1, %v228_v20, 0.0  ;;  %v231_v33 = vmul.f32 %v215_v26, %v215_v26  ;;  %v219_v45 = vld [vmem:[%s1175_s4 + $0x50] sm:$0xff]  ;;  %v220_v50 = vld [vmem:[%s1175_s4 + $0x58] sm:$0xff]  ;;  %v221_v54 = vld [vmem:[%s1175_s4 + $0x60] sm:$0xff] }
   0xa   :  { %822 = vmatpush3.bf16.msra.mxu0 %v819_v18  ;;  %v244_v27 = vadd.f32 %v243_v25, %v242_v23  ;;  %v249_v34 = vsel %vm241_vm1, %v229_v24, 0.0  ;;  %v232_v37 = vmul.f32 %v216_v31, %v216_v31  ;;  %v251_v38 = vsel %vm241_vm1, %v230_v28, 0.0  ;;  %v222_v59 = vld [vmem:[%s1175_s4 + $0x68] sm:$0xff]  ;;  %v223_v63 = vld [vmem:[%s1175_s4 + $0x70] sm:$0xff]  ;;  %v224_v4 = vld [vmem:[%s1175_s4 + $0x78] sm:$0xff] }
   0xb   :  { %818 = vmatpush3.bf16.msra.mxu1 %v815_v9  ;;  %824 = vmatprep.subr.bf16.mxu0 %v823_v21  ;;  %v827_v39 = vpack.c.bf16 %v214_v22, %v213_v15  ;;  %v831_v40 = vpack.c.bf16 %v216_v31, %v215_v26  ;;  %v233_v43 = vmul.f32 %v217_v35, %v217_v35  ;;  %v253_v44 = vsel %vm241_vm1, %v231_v33, 0.0 }
   0xc   :  { %v246_v32 = vadd.f32 %v245_v29, %v244_v27  ;;  %v234_v47 = vmul.f32 %v218_v41, %v218_v41  ;;  %v255_v48 = vsel %vm241_vm1, %v232_v37, 0.0  ;;  %v835_v49 = vpack.c.bf16 %v218_v41, %v217_v35  ;;  %v495_v37 = vld [vmem:[%s1176_s5] sm:$0xff]  ;;  %v498_v41 = vld [vmem:[%s1176_s5 + $0x18] sm:$0xff] }
   0xd   :  { %v235_v52 = vmul.f32 %v219_v45, %v219_v45  ;;  %v257_v53 = vsel %vm241_vm1, %v233_v43, 0.0  ;;  %v236_v56 = vmul.f32 %v220_v50, %v220_v50  ;;  %v839_v58 = vpack.c.bf16 %v220_v50, %v219_v45  ;;  %v499_v43 = vld [vmem:[%s1176_s5 + $0x20] sm:$0xff] }
   0xe   :  { %826 = vmatpush3.bf16.msra.mxu0 %v823_v21  ;;  %v248_v36 = vadd.f32 %v247_v30, %v246_v32  ;;  %v259_v57 = vsel %vm241_vm1, %v234_v47, 0.0  ;;  %v237_v61 = vmul.f32 %v221_v54, %v221_v54  ;;  %v238_v1 = vmul.f32 %v222_v59, %v222_v59  ;;  %v657_v30 = vld [vmem:[%s1174_s3] ss:$0 sm:$0xff]  ;;  %v502_v47 = vld [vmem:[%s1176_s5 + $0x38] sm:$0xff] }
   0xf   :  { %828 = vmatprep.subr.bf16.mxu0 %v827_v39  ;;  %v261_v62 = vsel %vm241_vm1, %v235_v52, 0.0  ;;  %v263_v2 = vsel %vm241_vm1, %v236_v56, 0.0  ;;  %v843_v3 = vpack.c.bf16 %v222_v59, %v221_v54  ;;  %v239_v6 = vmul.f32 %v223_v63, %v223_v63  ;;  %v504_v54 = vld [vmem:[%s1176_s5 + $0x48] sm:$0xff]  ;;  %v505_v59 = vld [vmem:[%s1176_s5 + $0x50] sm:$0xff] }
  0x10   :  { %v250_v42 = vadd.f32 %v249_v34, %v248_v36  ;;  %v265_v7 = vsel %vm241_vm1, %v237_v61, 0.0  ;;  %v240_v9 = vmul.f32 %v224_v4, %v224_v4  ;;  %v267_v10 = vsel %vm241_vm1, %v238_v1, 0.0 }
  0x11   :  { %v269_v12 = vsel %vm241_vm1, %v239_v6, 0.0  ;;  %v847_v19 = vpack.c.bf16 %v224_v4, %v223_v63  ;;  %v935_v22 = vmov 0   ;;  %v508_v63 = vld [vmem:[%s1176_s5 + $0x68] sm:$0xff]  ;;  %v365_v6 = vlaneseq }
  0x12   :  { %v252_v46 = vadd.f32 %v251_v38, %v250_v42  ;;  %830 = vmatpush3.bf16.msra.mxu0 %v827_v39  ;;  %v271_v14 = vsel %vm241_vm1, %v240_v9, 0.0  ;;  %898 = vset.pattern.permute.xlu1 %v935_v22  ;;  %v496_v38 = vld [vmem:[%s1176_s5 + $0x8] sm:$0xff]  ;;  %v497_v39 = vld [vmem:[%s1176_s5 + $0x10] sm:$0xff] }
  0x13   :  { %832 = vmatprep.subr.bf16.mxu0 %v831_v40  ;;  %897 = vset.pattern.permute.xlu0 %v935_v22  ;;  %v859_v42 = vpack.c.bf16 %v498_v41, %v497_v39  ;;  %v369_v9 = vand.u32 127, %v365_v6 }
  0x14   :  { %v254_v51 = vadd.f32 %v253_v44, %v252_v46  ;;  %v500_v44 = vld [vmem:[%s1176_s5 + $0x28] sm:$0xff]  ;;  %v501_v46 = vld [vmem:[%s1176_s5 + $0x30] sm:$0xff] }
  0x15   :  { %v863_v45 = vpack.c.bf16 %v500_v44, %v499_v43 }
  0x16   :  { %v256_v55 = vadd.f32 %v255_v48, %v254_v51  ;;  %834 = vmatpush3.bf16.msra.mxu0 %v831_v40  ;;  %v855_v40 = vpack.c.bf16 %v496_v38, %v495_v37 }
  0x17   :  { %836 = vmatprep.subr.bf16.mxu0 %v835_v49 }
  0x18   :  { %v258_v60 = vadd.f32 %v257_v53, %v256_v55  ;;  %856 = vmatprep.subr.bf16.mxu1 %v855_v40  ;;  %v503_v53 = vld [vmem:[%s1176_s5 + $0x40] sm:$0xff]  ;;  %v936_v55 = vmov 0.0|0.0  }
  0x19   :  { %v871_v56 = vpack.c.bf16 %v504_v54, %v503_v53 }
  0x1a   :  { %v260_v0 = vadd.f32 %v259_v57, %v258_v60  ;;  %838 = vmatpush3.bf16.msra.mxu0 %v835_v49  ;;  %v867_v49 = vpack.c.bf16 %v502_v47, %v501_v46  ;;  %v506_v60 = vld [vmem:[%s1176_s5 + $0x58] sm:$0xff] }
  0x1b   :  { %840 = vmatprep.subr.bf16.mxu0 %v839_v58  ;;  %v875_v61 = vpack.c.bf16 %v506_v60, %v505_v59 }
  0x1c   :  { %v262_v5 = vadd.f32 %v261_v62, %v260_v0  ;;  %v507_v62 = vld [vmem:[%s1176_s5 + $0x60] sm:$0xff] }
  0x1d   :  { %v879_v0 = vpack.c.bf16 %v508_v63, %v507_v62 }
  0x1e   :  { %v264_v8 = vadd.f32 %v263_v2, %v262_v5  ;;  %842 = vmatpush3.bf16.msra.mxu0 %v839_v58  ;;  %v938_v58 = vmov 0.0   ;;  %v509_v2 = vld [vmem:[%s1176_s5 + $0x70] sm:$0xff] }
  0x1f   :  { %844 = vmatprep.subr.bf16.mxu0 %v843_v3 }
  0x20   :  { %v266_v11 = vadd.f32 %v265_v7, %v264_v8  ;;  %v366_v7 = vshrl.u32 %v365_v6, 7 }
  0x22   :  { %v268_v13 = vadd.f32 %v267_v10, %v266_v11  ;;  %846 = vmatpush3.bf16.msra.mxu0 %v843_v3  ;;  %v510_v3 = vld [vmem:[%s1176_s5 + $0x78] sm:$0xff]  ;;  %v367_v8 = vadd.s32 8, %v366_v7  ;;  %vm380_vm4 = vcmp.eq.s32.totalorder %v366_v7, %v369_v9  ;;  %vm465_vm11 = vcmp.lt.s32.totalorder %v369_v9, %v366_v7 }
  0x23   :  { %848 = vmatprep.subr.bf16.mxu0 %v847_v19  ;;  %v883_v4 = vpack.c.bf16 %v510_v3, %v509_v2 }
  0x24   :  { %v270_v15 = vadd.f32 %v269_v12, %v268_v13  ;;  %vm381_vm5 = vcmp.eq.s32.totalorder %v367_v8, %v369_v9  ;;  %v939_v13 = vmov 1.0   ;;  %vm466_vm7 = vcmp.lt.s32.totalorder %v369_v9, %v367_v8 }
  0x25   :  { %vm853_vm6 = vmpackc.low %vm381_vm5, %vm380_vm4 }
  0x26   :  { %v272_v16 = vadd.f32 %v271_v14, %v270_v15  ;;  %850 = vmatpush3.bf16.msra.mxu0 %v847_v19 }
  0x27   :  { %851 = vmatprep.subr.bf16.mxu0 %v936_v55 }
  0x28   :  { %273 = vadd.xlane.f32.xlu0 %v272_v16 }
  0xb5   :  { %v274_v20 = vpop.xlane.xlu0 %273 }
  0xb6   :  { %v275_v21 = vrot.slane %v274_v20, 4 }
  0xb8   :  { %v276_v23 = vadd.f32 %v275_v21, %v274_v20 }
  0xba   :  { %v277_v24 = vrot.slane %v276_v23, 2 }
  0xbc   :  { %v278_v25 = vadd.f32 %v277_v24, %v276_v23 }
  0xbe   :  { %v279_v26 = vrot.slane %v278_v25, 1 }
  0xc0   :  { %v280_v27 = vadd.f32 %v279_v26, %v278_v25 }
  0xc2   :  { %887 = vpush %v280_v27 }
  0xdc   :  { %v718_v17 = vpop.f32.mrb[0].mxu0 }
  0xdd   :  { %v105_v18 = vpop.f32.mrb[1].mxu0 }
  0xde   :  { %727 = vmatprep.mubr.msk.f32.mxu1 %vm125_vm2, %v105_v18  ;;  %v459_v18 = vsub.s32 0, %v366_v7 }
  0xdf   :  { %728 = vmatmul.mubr.msk.f32.vlgmr.msra.gmra.mrb[0].mxu1 %vm125_vm2, %v718_v17 }
  0xe0   :  { %858 = vmatpush3.bf16.msra.mxu1 %v855_v40 }
  0xe1   :  { %860 = vmatprep.subr.bf16.mxu1 %v859_v42 }
  0xe4   :  { %862 = vmatpush3.bf16.msra.mxu1 %v859_v42 }
  0xe5   :  { %864 = vmatprep.subr.bf16.mxu1 %v863_v45 }
  0xe8   :  { %866 = vmatpush3.bf16.msra.mxu1 %v863_v45 }
  0xe9   :  { %868 = vmatprep.subr.bf16.mxu1 %v867_v49 }
  0xec   :  { %870 = vmatpush3.bf16.msra.mxu1 %v867_v49 }
  0xed   :  { %872 = vmatprep.subr.bf16.mxu1 %v871_v56 }
  0xf0   :  { %874 = vmatpush3.bf16.msra.mxu1 %v871_v56 }
  0xf1   :  { %876 = vmatprep.subr.bf16.mxu1 %v875_v61 }
  0xf3   :  { %s888_s4 = spop %887 }
  0xf4   :  { %v282_v28 = vstv %s888_s4  ;;  %878 = vmatpush3.bf16.msra.mxu1 %v875_v61 }
  0xf5   :  { %899 = vrsqrt.f32 %v282_v28  ;;  %880 = vmatprep.subr.bf16.mxu1 %v879_v0  ;;  %v512_v28 = vstv %s1177_s6  ;;  %s940_s6 = smov [#allocation3]  }
  0xf6   :  { %s647_s27 = sshll.u32 %s940_s6, 4  ;;  %s648_s27 = int_to_ptr.vmem [resolvable:$true] %s647_s27 }
  0xf7   :  { %s911_s28 = scalar_lea.vmem %s648_s27, 16  ;;  %s915_s29 = scalar_lea.vmem %s648_s27, 32 }
  0xf8   :  { %882 = vmatpush3.bf16.msra.mxu1 %v879_v0  ;;  %p912_p0 = scmp.ne.s32.totalorder %s648_s27, %s911_s28  ;;  %p916_p1 = scmp.lt.s32.totalorder %s648_s27, %s648_s27 }
  0xf9   :  { %884 = vmatprep.subr.bf16.mxu1 %v883_v4  ;;  %p917_p2 = scmp.lt.s32.totalorder %s915_s29, %s911_s28 }
  0xfb   :  { %p918_p3 = por %p917_p2, %p916_p1 }
  0xfc   :  { %886 = vmatpush3.bf16.msra.mxu1 %v883_v4 }
  0xfd   :  { %p919_p4 = pnand %p918_p3, %p912_p0 }
  0xff   :  { %v900_v29 = vpop.eup %899 }
 0x100   :  { %889 = vpush %v900_v29 }
 0x131   :  { %s890_s10 = spop %889 }
 0x132   :  { %v360_v48 = vstv %s890_s10 }
 0x1b2   :  { %v729_v31 = vpop.f32.mrb[0].mxu1 }
 0x1b3   :  { %v1074_v32 = vadd.f32 %v729_v31, %v657_v30  ;;  %v198_v33 = vpop.f32.mrb[1].mxu1 }
 0x1b4   :  { %v1076_v34 = vadd.f32 %v657_v30, %v198_v33 }
 0x1b5   :  { %v208_v36 = vmax.f32 %v1074_v32, 0.0 }
 0x1b6   :  { %v207_v35 = vmax.f32 %v1076_v34, 0.0 }
 0x1b8   :  { %762 = vmatprep.mubr.f32.mxu0 %v207_v35 }
 0x1b9   :  { %763 = vmatmul.mubr.f32.vlgmr.msra.gmra.mrb[2].mxu0 %v208_v36 }
 0x1ba   :  { %769 = vmatprep.mubr.msk.f32.mxu0 %vm937_vm3, %v938_v58 }
 0x28c   :  { %v764_v50 = vpop.f32.mrb[2].mxu0 }
 0x28d   :  { %377 = vperm.xlu1 %898, %v764_v50   ;;  %v351_v51 = vpop.f32.mrb[3].mxu0  ;;  %v362_v57 = vmul.f32 %v764_v50, %v360_v48 }
 0x28e   :  { %v361_v52 = vmul.f32 %v360_v48, %v351_v51  ;;  %372 = vperm.xlu0 %897, %v351_v51  }
 0x290   :  { %901 = vtanh.f32 %v361_v52 }
 0x291   :  { %903 = vtanh.f32 %v362_v57 }
 0x29a   :  { %v902_v1 = vpop.eup %901 }
 0x29b   :  { %485 = vperm.xlu1 %898, %v902_v1   ;;  %v904_v5 = vpop.eup %903 }
 0x29f   :  { %490 = vperm.xlu1 %898, %v904_v5  }
 0x30c   :  { %v378_v10 = vpop.permute.xlu1 %377 }
 0x30d   :  { %v373_v11 = vpop.permute.xlu0 %372 }
 0x30e   :  { %v852_v12 = vpack.c.bf16 %v378_v10, %v373_v11 }
 0x310   :  { %854 = vmatpush3.bf16.msk.msra.mxu0 %vm853_vm6, %v852_v12 }
 0x313   :  { %770 = vmatmul.mubr.msk.f32.vlgmr.msra.gmra.mrb[4].mxu0 %vm32_vm0, %v939_v13 }
 0x31a   :  { %v486_v14 = vpop.permute.xlu1 %485 }
 0x31b   :  { %v1136_v15 = vmul.f32 %v486_v14, %v207_v35 }
 0x31d   :  { %804 = vmatprep.mubr.f32.mxu1 %v1136_v15 }
 0x31e   :  { %v491_v16 = vpop.permute.xlu1 %490 }
 0x31f   :  { %v1141_v17 = vmul.f32 %v491_v16, %v208_v36 }
 0x321   :  { %805 = vmatmul.mubr.f32.vlgmr.msra.gmra.mrb[2].mxu1 %v1141_v17 }
 0x3e6   :  { %v453_v19 = vpop.f32.mrb[4].mxu0 }
 0x3e7   :  { %v460_v20 = vrot.slane %v453_v19, %v459_v18  ;;  %v771_v21 = vpop.f32.mrb[5].mxu0 }
 0x3e9   :  { %vm462_vm8 = vcmp.gt.f32.partialorder %v460_v20, %v378_v10  ;;  %vm464_vm9 = vcmp.eq.f32.partialorder %v460_v20, %v378_v10  ;;  %vm463_vm10 = vcmp.eq.f32.partialorder %v460_v20, %v373_v11  ;;  %vm461_vm13 = vcmp.gt.f32.partialorder %v460_v20, %v373_v11 }
 0x3ea   :  { %vm468_vm12 = vmand %vm464_vm9, %vm466_vm7 }
 0x3eb   :  { %vm470_vm14 = vmor %vm462_vm8, %vm468_vm12 }
 0x3ec   :  { %v472_v22 = vsel %vm470_vm14, 1.0, %v938_v58  ;;  %vm467_vm15 = vmand %vm463_vm10, %vm465_vm11 }
 0x3ed   :  { %v476_v23 = vsel %vm32_vm0, %v472_v22, 0.0  ;;  %vm469_vm2 = vmor %vm461_vm13, %vm467_vm15 }
 0x3ee   :  { %477 = vadd.xlane.f32.xlu0 %v476_v23  ;;  %v471_v24 = vsel %vm469_vm2, 1.0, %v938_v58 }
 0x3ef   :  { %v473_v25 = vsel %vm32_vm0, %v471_v24, 0.0 }
 0x3f0   :  { %474 = vadd.xlane.f32.xlu1 %v473_v25 }
 0x3f4   :  { %v806_v26 = vpop.f32.mrb[2].mxu1 }
 0x3f5   :  { %v579_v27 = vpop.f32.mrb[3].mxu1  ;;  %v585_v30 = vadd.f32 %v806_v26, %v512_v28 }
 0x3f6   :  { %v580_v33 = vadd.f32 %v579_v27, %v512_v28 }
 0x47b   :  { %v478_v29 = vpop.xlane.xlu0 %477 }
 0x47c   :  { %vm480_vm3 = vcmp.lt.f32.partialorder %v478_v29, 13.0 }
 0x47d   :  { %v482_v31 = vsel %vm480_vm3, 1.0, %v938_v58  ;;  %v475_v32 = vpop.xlane.xlu1 %474 }
 0x47e   :  { %vm589_vm4 = vcmp.gt.f32.partialorder %v482_v31, 0.0  ;;  %vm479_vm5 = vcmp.lt.f32.partialorder %v475_v32, 13.0 }
 0x47f   :  { %v591_v34 = vsel %vm589_vm4, %v585_v30, -1e+30  ;;  %v481_v35 = vsel %vm479_vm5, 1.0, %v938_v58 }
 0x480   :  { %v593_v36 = vsel %vm241_vm1, %v591_v34, -inf  ;;  %vm588_vm0 = vcmp.gt.f32.partialorder %v481_v35, 0.0 }
 0x481   :  { %v590_v37 = vsel %vm588_vm0, %v580_v33, -1e+30 }
 0x482   :  { %v592_v38 = vsel %vm241_vm1, %v590_v37, -inf }
 0x483   :  { %v594_v39 = vmax.f32 %v592_v38, %v593_v36 }
 0x485   :  { %v595_v40 = vrot.slane %v594_v39, 4 }
 0x487   :  { %v596_v41 = vmax.f32 %v594_v39, %v595_v40 }
 0x489   :  { %v597_v42 = vrot.slane %v596_v41, 2 }
 0x48b   :  { %v598_v43 = vmax.f32 %v596_v41, %v597_v42 }
 0x48d   :  { %v599_v44 = vrot.slane %v598_v43, 1 }
 0x48f   :  { %v600_v45 = vmax.f32 %v598_v43, %v599_v44 }
 0x491   :  { %v601_v46 = vsub.f32 %v590_v37, %v600_v45  ;;  %v602_v47 = vsub.f32 %v591_v34, %v600_v45 }
 0x493   :  { %v603_v48 = vmul.f32 1.442695, %v601_v46  ;;  %v605_v49 = vmul.f32 1.442695, %v602_v47 }
 0x495   :  { %905 = vpow2.f32 %v603_v48 }
 0x496   :  { %907 = vpow2.f32 %v605_v49 }
 0x49f   :  { %v906_v50 = vpop.eup %905 }
 0x4a0   :  { %v908_v51 = vpop.eup %907  ;;  %v607_v52 = vmul.f32 %v906_v50, %v481_v35 }
 0x4a1   :  { %v608_v53 = vmul.f32 %v908_v51, %v482_v31 }
 0x4a2   :  { %v609_v54 = vsel %vm241_vm1, %v607_v52, 0.0 }
 0x4a3   :  { %v610_v55 = vsel %vm241_vm1, %v608_v53, 0.0 }
 0x4a4   :  { %v611_v56 = vadd.f32 %v610_v55, %v609_v54 }
 0x4a6   :  { %v612_v57 = vrot.slane %v611_v56, 4 }
 0x4a8   :  { %v613_v58 = vadd.f32 %v612_v57, %v611_v56 }
 0x4aa   :  { %v614_v59 = vrot.slane %v613_v58, 2 }
 0x4ac   :  { %v615_v60 = vadd.f32 %v614_v59, %v613_v58 }
 0x4ae   :  { %v616_v61 = vrot.slane %v615_v60, 1 }
 0x4b0   :  { %v617_v62 = vadd.f32 %v616_v61, %v615_v60 }
 0x4b2   :  { %909 = vrcp.f32 %v617_v62 }
 0x4bc   :  { %v910_v63 = vpop.eup %909 }
 0x4bd   :  { %v619_v0 = vmul.f32 %v910_v63, %v607_v52  ;;  %v620_v1 = vmul.f32 %v910_v63, %v608_v53 }
 0x4bf   :  { %623 = vperm.xlu1 %898, %v619_v0  }
 0x4c3   :  { %628 = vperm.xlu1 %898, %v620_v1  }
 0x53e   :  { %v624_v2 = vpop.permute.xlu1 %623 }
 0x53f   :  { %v631_v4 = vmul.f32 %v624_v2, %v1136_v15 }
 0x542   :  { %v629_v3 = vpop.permute.xlu1 %628 }
 0x543   :  { %v632_v5 = vmul.f32 %v629_v3, %v1141_v17 }
 0x545   :  { %v633_v6 = vadd.f32 %v632_v5, %v631_v4 }
 0x547   :  { %v634_v7 = vrot.slane %v633_v6, 4 }
 0x549   :  { %v635_v8 = vadd.f32 %v634_v7, %v633_v6 }
 0x54b   :  { %v636_v9 = vrot.slane %v635_v8, 2 }
 0x54d   :  { %v637_v10 = vadd.f32 %v636_v9, %v635_v8 }
 0x54f   :  { %v638_v11 = vrot.slane %v637_v10, 1 }
 0x551   :  { %v639_v12 = vadd.f32 %v638_v11, %v637_v10 }
 0x553   :  { %640 = vst [vmem:[#allocation3] sm:$0x1] %v639_v12 }
 0x554   :  { %922 = shalt.err (!%p919_p4)
}
 0x555   :  { %s923_s9 = scalar_lea.hbm %s1178_s7, 16 }
 0x556   :  { %p924_p5 = scmp.ne.s32.totalorder %s1178_s7, %s923_s9  ;;  %p927_p6 = scmp.lt.u32.totalorder %s923_s9, %s1178_s7 }
 0x558   :  { %p929_p7 = pnand %p927_p6, %p924_p5 }
 0x55a   :  { %932 = shalt.err (!%p929_p7)
}
 0x55b   :  { %650 = dma.vmem_to_hbm [thread:$0]  %s648_s27, 16, %s1178_s7, [#allocation4]  }
 0x55c   :  { %933 = dma.done.wait [#allocation4], 16  }
 0x55d   :  { %934 = vsyncadd [#allocation4], 4294967280 }
 0x55e   :  { %654 = vsyncpa [#allocation4], 1 }

</bundles_post_ra>
